<compile_context>
chip_gen: v6e
topology: v6e:2x2x1
jax: 0.10.0
libtpu: 0.0.40
codegen_flags: <defaults>
</compile_context>

<pallas_src>
import functools

import jax
import jax.numpy as jnp
from jax.experimental import pallas as pl
from jax.experimental.pallas import tpu as pltpu


_SUB_BF16 = 16  # bf16 sublane packing granularity


def _align(v, m):
    return ((v + m - 1) // m) * m


def _slab_offsets(f, d0, d1):
    """16-row-aligned sections inside the bf16 weight slab."""
    r_w1l = 0
    r_w1r = _align(r_w1l + f, _SUB_BF16)
    r_w2l = _align(r_w1r + f, _SUB_BF16)
    r_w2r = _align(r_w2l + d0, _SUB_BF16)
    rows = _align(r_w2r + d0, _SUB_BF16)
    return r_w1l, r_w1r, r_w2l, r_w2r, rows


def pack_params(params):
    """Pack all parameters ONCE (call at init, outside the per-forward jit)."""
    f, d0 = params["w1_l"].shape
    d1 = params["w2_l"].shape[1]
    r_w1l, r_w1r, r_w2l, r_w2r, rows = _slab_offsets(f, d0, d1)
    w = jnp.zeros((rows, 128), jnp.bfloat16)
    w = w.at[r_w1l:r_w1l + f, :d0].set(params["w1_l"].astype(jnp.bfloat16))
    w = w.at[r_w1r:r_w1r + f, :d0].set(params["w1_r"].astype(jnp.bfloat16))
    w = w.at[r_w2l:r_w2l + d0, :d1].set(params["w2_l"].astype(jnp.bfloat16))
    w = w.at[r_w2r:r_w2r + d0, :d1].set(params["w2_r"].astype(jnp.bfloat16))
    b = jnp.zeros((8, 128), jnp.float32)
    b = b.at[0, :d0].set(params["b1_l"].reshape(-1))
    b = b.at[1, :d1].set(params["b2_l"].reshape(-1))
    b = b.at[2, :d1].set(params["w_last"].reshape(-1))
    b = b.at[3, 0].set(params["b_last"].reshape(()))
    return w, b


def _make_sage_kernel(n, f, d0, d1, g_pad):
    r_w1l, r_w1r, r_w2l, r_w2r, _ = _slab_offsets(f, d0, d1)

    def kernel(a_ref, x_ref, p_ref, invd_ref, w_ref, b_ref, out_ref):
        a = a_ref[0]              # (n, n)      bf16 exact edge-count adjacency
        x = x_ref[0]              # (n, f)      bf16 node features
        p = p_ref[0]              # (g_pad, n)  bf16 0/1 pooling matrix
        inv_deg = invd_ref[0]     # (n, 1)      f32 1/deg (0 for isolated/pad)

        w1l = w_ref[r_w1l:r_w1l + f, 0:d0]     # bf16 weights (pre-packed)
        w1r = w_ref[r_w1r:r_w1r + f, 0:d0]
        w2l = w_ref[r_w2l:r_w2l + d0, 0:d1]
        w2r = w_ref[r_w2r:r_w2r + d0, 0:d1]
        b1 = b_ref[0:1, 0:d0]                  # (1, d0) f32
        b2 = b_ref[1:2, 0:d1]                  # (1, d1) f32
        wf = b_ref[2:3, 0:d1]                  # (1, d1) f32  last-linear weight
        bl = b_ref[3:4, 0:1]                   # (1, 1)  f32  last-linear bias

        # ---- SAGEConv layer 1: relu(inv_deg*(A @ (x @ W1_l)) + b1 + x @ W1_r)
        z1l = jnp.dot(x, w1l, preferred_element_type=jnp.float32)      # (n, d0)
        z1r = jnp.dot(x, w1r, preferred_element_type=jnp.float32)      # (n, d0)
        agg1 = jnp.dot(a, z1l.astype(jnp.bfloat16),
                       preferred_element_type=jnp.float32)             # (n, d0)
        h1 = jnp.maximum(inv_deg * agg1 + b1 + z1r, 0.0)               # f32

        # ---- SAGEConv layer 2 ------------------------------------------------
        h1b = h1.astype(jnp.bfloat16)
        z2l = jnp.dot(h1b, w2l, preferred_element_type=jnp.float32)    # (n, d1)
        z2r = jnp.dot(h1b, w2r, preferred_element_type=jnp.float32)    # (n, d1)
        agg2 = jnp.dot(a, z2l.astype(jnp.bfloat16),
                       preferred_element_type=jnp.float32)             # (n, d1)
        h2 = jnp.maximum(inv_deg * agg2 + b2 + z2r, 0.0)               # f32

        # ---- per-graph sum pooling (bf16 x bf16, f32 accumulate) -------------
        pooled = jnp.dot(p, h2.astype(jnp.bfloat16),
                         preferred_element_type=jnp.float32)           # (g_pad, d1)

        # ---- last_linear(d1 -> 1) on VPU/XLU, sigmoid on the real column only
        logit = jnp.sum(pooled * wf, axis=-1, keepdims=True) + bl      # (g_pad, 1)
        prob = jax.nn.sigmoid(logit)
        out_ref[0] = jnp.broadcast_to(prob, (g_pad, 128))  # lane-dense store

    return kernel


def _sage_pallas_batched(a_stack, x_stack, p_stack, invd_stack, wslab, bslab,
                         d0, d1):
    """a (B,N,N) bf16, x (B,N,F) bf16, p (B,G_pad,N) bf16, invd (B,N,1) f32."""
    b, n, _ = a_stack.shape
    f = x_stack.shape[2]
    g_pad = p_stack.shape[1]
    w_rows = wslab.shape[0]
    kernel = _make_sage_kernel(n, f, d0, d1, g_pad)

    flops = 2 * b * (2 * n * f * d0 + n * n * d0 + 2 * n * d0 * d1
                     + n * n * d1 + g_pad * n * d1 + g_pad * d1)
    bytes_accessed = (b * (2 * n * n + 2 * n * f + 2 * g_pad * n + 4 * n
                           + 4 * g_pad * 128)
                      + 2 * w_rows * 128 + 4 * 8 * 128)
    cost = pl.CostEstimate(flops=flops, transcendentals=b * g_pad,
                           bytes_accessed=bytes_accessed)

    return pl.pallas_call(
        kernel,
        out_shape=jax.ShapeDtypeStruct((b, g_pad, 128), jnp.float32),
        grid_spec=pltpu.PrefetchScalarGridSpec(
            num_scalar_prefetch=0,
            grid=(b,),
            in_specs=[
                pl.BlockSpec((1, n, n), lambda i: (i, 0, 0)),
                pl.BlockSpec((1, n, f), lambda i: (i, 0, 0)),
                pl.BlockSpec((1, g_pad, n), lambda i: (i, 0, 0)),
                pl.BlockSpec((1, n, 1), lambda i: (i, 0, 0)),
                pl.BlockSpec((w_rows, 128), lambda i: (0, 0)),  # shared weights
                pl.BlockSpec((8, 128), lambda i: (0, 0)),       # shared biases
            ],
            out_specs=pl.BlockSpec((1, g_pad, 128), lambda i: (i, 0, 0)),
        ),
        compiler_params=pltpu.CompilerParams(
            dimension_semantics=("parallel",)),  # graph-batches are independent
        cost_estimate=cost,
    )(a_stack, x_stack, p_stack, invd_stack, wslab, bslab)


@functools.partial(jax.jit,
                   static_argnames=("num_graphs", "d0", "d1", "node_multiple"))
def sage_conv_forward(x, edge_index, batch, wslab, bslab, *,
                      num_graphs, d0=8, d1=8, node_multiple=128):
    """Forward for one PyG-style graph batch. num_graphs is static (no sync)."""
    n_real, f = x.shape
    n_pad = max(node_multiple, _align(n_real, node_multiple))
    g_pad = max(8, _align(num_graphs, 8))

    src, dst = edge_index[0], edge_index[1]
    # Edge-count adjacency (messages src -> dst); counts are exact in bf16 and
    # match PyG scatter-mean for duplicate edges. Padded rows/cols stay zero.
    adj = jnp.zeros((n_pad, n_pad), jnp.float32).at[dst, src].add(1.0)
    deg = jnp.sum(adj, axis=1, keepdims=True)
    inv_deg = jnp.where(deg > 0.0, 1.0 / jnp.maximum(deg, 1.0), 0.0)  # (n_pad,1)

    # Padded nodes get batch id -1 so the pooling matrix never selects them.
    batch_pad = jnp.full((n_pad,), -1, jnp.int32).at[:n_real].set(
        batch.astype(jnp.int32))
    pool = (batch_pad[None, :] == jnp.arange(g_pad)[:, None]).astype(jnp.bfloat16)

    x_pad = jnp.zeros((n_pad, f), jnp.bfloat16).at[:n_real, :].set(
        x.astype(jnp.bfloat16))

    out = _sage_pallas_batched(
        adj.astype(jnp.bfloat16)[None], x_pad[None], pool[None], inv_deg[None],
        wslab, bslab, d0, d1)
    return out[0, :num_graphs, :1]


def init_params(key, num_features, latent_dim=(8, 8)):
    """Deterministic synthetic parameters matching the module's shapes.
    SAGEConv(in, out): lin_l (in->out, bias), lin_r (in->out, no bias).
    Weights stored as (in, out) so the kernel uses x @ W."""
    keys = jax.random.split(key, 7)
    d0, d1 = latent_dim
    scale = 0.1
    return {
        "w1_l": scale * jax.random.normal(keys[0], (num_features, d0), jnp.float32),
        "b1_l": scale * jax.random.normal(keys[1], (1, d0), jnp.float32),
        "w1_r": scale * jax.random.normal(keys[2], (num_features, d0), jnp.float32),
        "w2_l": scale * jax.random.normal(keys[3], (d0, d1), jnp.float32),
        "b2_l": scale * jax.random.normal(keys[4], (1, d1), jnp.float32),
        "w2_r": scale * jax.random.normal(keys[5], (d0, d1), jnp.float32),
        "w_last": scale * jax.random.normal(keys[6], (d1, 1), jnp.float32),
        "b_last": jnp.zeros((1, 1), jnp.float32),
    }


def _reference_forward(x, edge_index, batch, params, num_graphs):
    """Pure-JAX f32 reference of the PyTorch module (for a tolerance check)."""
    n = x.shape[0]
    src, dst = edge_index[0], edge_index[1]
    adj = jnp.zeros((n, n), jnp.float32).at[dst, src].add(1.0)
    deg = jnp.sum(adj, axis=1, keepdims=True)
    a_mean = jnp.where(deg > 0, adj / jnp.maximum(deg, 1.0), 0.0)
    h = x
    for wl, bl_, wr in ((params["w1_l"], params["b1_l"], params["w1_r"]),
                        (params["w2_l"], params["b2_l"], params["w2_r"])):
        h = jnp.maximum((a_mean @ h) @ wl + bl_ + h @ wr, 0.0)
    pool = (batch[None, :] == jnp.arange(num_graphs)[:, None]).astype(jnp.float32)
    pooled = pool @ h
    return jax.nn.sigmoid(pooled @ params["w_last"] + params["b_last"])


if __name__ == "__main__":
    key = jax.random.PRNGKey(0)
    k_x, k_e, k_p = jax.random.split(key, 3)

    N = 32          # nodes in the graph batch
    F = 16          # node features (dataset.num_features)
    E = 64          # edges
    G = 2           # graphs in the batch

    x = jax.random.normal(k_x, (N, F), jnp.float32)
    edge_index = jax.random.randint(k_e, (2, E), 0, N, jnp.int32)
    batch = jnp.concatenate(
        [jnp.zeros((N // 2,), jnp.int32), jnp.ones((N - N // 2,), jnp.int32)])

    params = init_params(k_p, F, latent_dim=(8, 8))
    wslab, bslab = pack_params(params)   # packed ONCE, outside the jitted path

    out = sage_conv_forward(x, edge_index, batch, wslab, bslab, num_graphs=G)
    out = jax.block_until_ready(out)

    assert out.shape == (G, 1)
    assert bool(jnp.all((out >= 0.0) & (out <= 1.0)))
    ref = _reference_forward(x, edge_index, batch, params, G)
    assert bool(jnp.max(jnp.abs(out - ref)) < 5e-2), "mismatch vs f32 reference"
    print("KERNEL_OK")
</pallas_src>

<mosaic_0001>
module attributes {stable_mosaic.version = 11 : i64} {
  func.func private @main(%arg0: i32) attributes {dimension_semantics = [#tpu.dimension_semantics<core_parallel>], iteration_bounds = array<i64: 2>, tpu.core_type = #tpu.core_type<sc_scalar_subcore>, window_params = []} {
    return
  }
}

module attributes {stable_mosaic.version = 11 : i64} {
  func.func private @main(%arg0: i32) attributes {dimension_semantics = [#tpu.dimension_semantics<core_parallel>], iteration_bounds = array<i64: 2>, tpu.core_type = #tpu.core_type<sc_scalar_subcore>, window_params = []} {
    return
  }
}

module attributes {stable_mosaic.version = 11 : i64} {
  func.func @kernel(%arg0: i32, %arg1: memref<1x128x128xbf16, #tpu.memory_space<vmem>>, %arg2: memref<1x128x16xbf16, #tpu.memory_space<vmem>>, %arg3: memref<1x8x128xbf16, #tpu.memory_space<vmem>>, %arg4: memref<1x128x1xf32, #tpu.memory_space<vmem>>, %arg5: memref<64x128xbf16, #tpu.memory_space<vmem>>, %arg6: memref<8x128xf32, #tpu.memory_space<vmem>>, %arg7: memref<1x8x128xf32, #tpu.memory_space<vmem>>) attributes {dimension_semantics = [#tpu.dimension_semantics<parallel>], iteration_bounds = array<i64: 1>, scalar_prefetch = 0 : i64, scratch_operands = 0 : i64, tpu.core_type = #tpu.core_type<tc>, window_params = [{transform_indices = @transform_0, window_bounds = array<i64: 1, 128, 128>}, {transform_indices = @transform_1, window_bounds = array<i64: 1, 128, 16>}, {transform_indices = @transform_2, window_bounds = array<i64: 1, 8, 128>}, {transform_indices = @transform_3, window_bounds = array<i64: 1, 128, 1>}, {pipeline_mode = #tpu.pipeline_mode<synchronous>, transform_indices = @transform_4, window_bounds = array<i64: 64, 128>}, {pipeline_mode = #tpu.pipeline_mode<synchronous>, transform_indices = @transform_5, window_bounds = array<i64: 8, 128>}, {transform_indices = @transform_6, window_bounds = array<i64: 1, 8, 128>}]} {
    %c0 = arith.constant 0 : index
    %c0_0 = arith.constant 0 : index
    %c0_1 = arith.constant 0 : index
    %0 = vector.load %arg1[%c0, %c0_0, %c0_1] : memref<1x128x128xbf16, #tpu.memory_space<vmem>>, vector<1x128x128xbf16>
    %1 = vector.shape_cast %0 : vector<1x128x128xbf16> to vector<128x128xbf16>
    %c0_2 = arith.constant 0 : index
    %c0_3 = arith.constant 0 : index
    %c0_4 = arith.constant 0 : index
    %2 = vector.load %arg2[%c0_2, %c0_3, %c0_4] : memref<1x128x16xbf16, #tpu.memory_space<vmem>>, vector<1x128x16xbf16>
    %3 = vector.shape_cast %2 : vector<1x128x16xbf16> to vector<128x16xbf16>
    %c0_5 = arith.constant 0 : index
    %c0_6 = arith.constant 0 : index
    %c0_7 = arith.constant 0 : index
    %4 = vector.load %arg3[%c0_5, %c0_6, %c0_7] : memref<1x8x128xbf16, #tpu.memory_space<vmem>>, vector<1x8x128xbf16>
    %5 = vector.shape_cast %4 : vector<1x8x128xbf16> to vector<8x128xbf16>
    %c0_8 = arith.constant 0 : index
    %c0_9 = arith.constant 0 : index
    %c0_10 = arith.constant 0 : index
    %6 = vector.load %arg4[%c0_8, %c0_9, %c0_10] : memref<1x128x1xf32, #tpu.memory_space<vmem>>, vector<1x128x1xf32>
    %7 = vector.shape_cast %6 : vector<1x128x1xf32> to vector<128x1xf32>
    %c0_11 = arith.constant 0 : index
    %c0_12 = arith.constant 0 : index
    %8 = vector.load %arg5[%c0_11, %c0_12] : memref<64x128xbf16, #tpu.memory_space<vmem>>, vector<16x8xbf16>
    %c16 = arith.constant 16 : index
    %c0_13 = arith.constant 0 : index
    %9 = vector.load %arg5[%c16, %c0_13] : memref<64x128xbf16, #tpu.memory_space<vmem>>, vector<16x8xbf16>
    %c32 = arith.constant 32 : index
    %c0_14 = arith.constant 0 : index
    %10 = vector.load %arg5[%c32, %c0_14] : memref<64x128xbf16, #tpu.memory_space<vmem>>, vector<8x8xbf16>
    %c48 = arith.constant 48 : index
    %c0_15 = arith.constant 0 : index
    %11 = vector.load %arg5[%c48, %c0_15] : memref<64x128xbf16, #tpu.memory_space<vmem>>, vector<8x8xbf16>
    %c0_16 = arith.constant 0 : index
    %c0_17 = arith.constant 0 : index
    %12 = vector.load %arg6[%c0_16, %c0_17] : memref<8x128xf32, #tpu.memory_space<vmem>>, vector<1x8xf32>
    %c1 = arith.constant 1 : index
    %c0_18 = arith.constant 0 : index
    %13 = vector.load %arg6[%c1, %c0_18] : memref<8x128xf32, #tpu.memory_space<vmem>>, vector<1x8xf32>
    %c2 = arith.constant 2 : index
    %c0_19 = arith.constant 0 : index
    %14 = vector.load %arg6[%c2, %c0_19] : memref<8x128xf32, #tpu.memory_space<vmem>>, vector<1x8xf32>
    %c3 = arith.constant 3 : index
    %c0_20 = arith.constant 0 : index
    %15 = vector.load %arg6[%c3, %c0_20] : memref<8x128xf32, #tpu.memory_space<vmem>>, vector<1x1xf32>
    %cst = arith.constant dense<0.000000e+00> : vector<128x8xf32>
    %16 = tpu.matmul %3, %8, %cst {dimension_numbers = #tpu.dot_dimension_numbers<[1], [0], [0], [1], [0, 0, 1, 1], [], []>} : vector<128x16xbf16>, vector<16x8xbf16>, vector<128x8xf32> -> vector<128x8xf32>
    %cst_21 = arith.constant dense<0.000000e+00> : vector<128x8xf32>
    %17 = tpu.matmul %3, %9, %cst_21 {dimension_numbers = #tpu.dot_dimension_numbers<[1], [0], [0], [1], [0, 0, 1, 1], [], []>} : vector<128x16xbf16>, vector<16x8xbf16>, vector<128x8xf32> -> vector<128x8xf32>
    %18 = arith.truncf %16 : vector<128x8xf32> to vector<128x8xbf16>
    %cst_22 = arith.constant dense<0.000000e+00> : vector<128x8xf32>
    %19 = tpu.matmul %1, %18, %cst_22 {dimension_numbers = #tpu.dot_dimension_numbers<[1], [0], [0], [1], [0, 0, 1, 1], [], []>} : vector<128x128xbf16>, vector<128x8xbf16>, vector<128x8xf32> -> vector<128x8xf32>
    %20 = vector.broadcast %7 : vector<128x1xf32> to vector<128x8xf32>
    %21 = arith.mulf %20, %19 : vector<128x8xf32>
    %22 = vector.broadcast %12 : vector<1x8xf32> to vector<128x8xf32>
    %23 = arith.addf %21, %22 : vector<128x8xf32>
    %24 = arith.addf %23, %17 : vector<128x8xf32>
    %cst_23 = arith.constant 0.000000e+00 : f32
    %25 = vector.broadcast %cst_23 : f32 to vector<128x8xf32>
    %26 = arith.maximumf %24, %25 : vector<128x8xf32>
    %27 = arith.truncf %26 : vector<128x8xf32> to vector<128x8xbf16>
    %cst_24 = arith.constant dense<0.000000e+00> : vector<128x8xf32>
    %28 = tpu.matmul %27, %10, %cst_24 {dimension_numbers = #tpu.dot_dimension_numbers<[1], [0], [0], [1], [0, 0, 1, 1], [], []>} : vector<128x8xbf16>, vector<8x8xbf16>, vector<128x8xf32> -> vector<128x8xf32>
    %cst_25 = arith.constant dense<0.000000e+00> : vector<128x8xf32>
    %29 = tpu.matmul %27, %11, %cst_25 {dimension_numbers = #tpu.dot_dimension_numbers<[1], [0], [0], [1], [0, 0, 1, 1], [], []>} : vector<128x8xbf16>, vector<8x8xbf16>, vector<128x8xf32> -> vector<128x8xf32>
    %30 = arith.truncf %28 : vector<128x8xf32> to vector<128x8xbf16>
    %cst_26 = arith.constant dense<0.000000e+00> : vector<128x8xf32>
    %31 = tpu.matmul %1, %30, %cst_26 {dimension_numbers = #tpu.dot_dimension_numbers<[1], [0], [0], [1], [0, 0, 1, 1], [], []>} : vector<128x128xbf16>, vector<128x8xbf16>, vector<128x8xf32> -> vector<128x8xf32>
    %32 = vector.broadcast %7 : vector<128x1xf32> to vector<128x8xf32>
    %33 = arith.mulf %32, %31 : vector<128x8xf32>
    %34 = vector.broadcast %13 : vector<1x8xf32> to vector<128x8xf32>
    %35 = arith.addf %33, %34 : vector<128x8xf32>
    %36 = arith.addf %35, %29 : vector<128x8xf32>
    %cst_27 = arith.constant 0.000000e+00 : f32
    %37 = vector.broadcast %cst_27 : f32 to vector<128x8xf32>
    %38 = arith.maximumf %36, %37 : vector<128x8xf32>
    %39 = arith.truncf %38 : vector<128x8xf32> to vector<128x8xbf16>
    %cst_28 = arith.constant dense<0.000000e+00> : vector<8x8xf32>
    %40 = tpu.matmul %5, %39, %cst_28 {dimension_numbers = #tpu.dot_dimension_numbers<[1], [0], [0], [1], [0, 0, 1, 1], [], []>} : vector<8x128xbf16>, vector<128x8xbf16>, vector<8x8xf32> -> vector<8x8xf32>
    %41 = vector.broadcast %14 : vector<1x8xf32> to vector<8x8xf32>
    %42 = arith.mulf %40, %41 : vector<8x8xf32>
    %cst_29 = arith.constant dense<0.000000e+00> : vector<8xf32>
    %43 = vector.multi_reduction <add>, %42, %cst_29 [1] : vector<8x8xf32> to vector<8xf32>
    %44 = vector.shape_cast %43 : vector<8xf32> to vector<8x1xf32>
    %45 = vector.broadcast %15 : vector<1x1xf32> to vector<8x1xf32>
    %46 = arith.addf %44, %45 : vector<8x1xf32>
    %47 = arith.negf %46 : vector<8x1xf32>
    %48 = math.exp %47 : vector<8x1xf32>
    %cst_30 = arith.constant 1.000000e+00 : f32
    %49 = vector.broadcast %cst_30 : f32 to vector<8x1xf32>
    %50 = arith.addf %49, %48 : vector<8x1xf32>
    %51 = arith.divf %49, %50 : vector<8x1xf32>
    %52 = vector.shape_cast %51 : vector<8x1xf32> to vector<8x1xf32>
    %53 = vector.broadcast %52 : vector<8x1xf32> to vector<8x128xf32>
    %c0_31 = arith.constant 0 : index
    %c0_32 = arith.constant 0 : index
    %c0_33 = arith.constant 0 : index
    %54 = vector.load %arg7[%c0_31, %c0_32, %c0_33] : memref<1x8x128xf32, #tpu.memory_space<vmem>>, vector<1x8x128xf32>
    %55 = vector.shape_cast %54 : vector<1x8x128xf32> to vector<8x128xf32>
    %56 = vector.shape_cast %53 : vector<8x128xf32> to vector<1x8x128xf32>
    tpu.vector_store %arg7[%c0_31, %c0_32, %c0_33], %56 {strides = array<i32>} : memref<1x8x128xf32, #tpu.memory_space<vmem>>, vector<1x8x128xf32>,
    return
  }
  func.func @transform_0(%arg0: i32) -> (i32, i32, i32) {
    %c0_i32 = arith.constant 0 : i32
    %c0_i32_0 = arith.constant 0 : i32
    %c0_i32_1 = arith.constant 0 : i32
    return %arg0, %c0_i32, %c0_i32_0 : i32, i32, i32
  }
  func.func @transform_1(%arg0: i32) -> (i32, i32, i32) {
    %c0_i32 = arith.constant 0 : i32
    %c0_i32_0 = arith.constant 0 : i32
    %c0_i32_1 = arith.constant 0 : i32
    return %arg0, %c0_i32, %c0_i32_0 : i32, i32, i32
  }
  func.func @transform_2(%arg0: i32) -> (i32, i32, i32) {
    %c0_i32 = arith.constant 0 : i32
    %c0_i32_0 = arith.constant 0 : i32
    %c0_i32_1 = arith.constant 0 : i32
    return %arg0, %c0_i32, %c0_i32_0 : i32, i32, i32
  }
  func.func @transform_3(%arg0: i32) -> (i32, i32, i32) {
    %c0_i32 = arith.constant 0 : i32
    %c0_i32_0 = arith.constant 0 : i32
    %c0_i32_1 = arith.constant 0 : i32
    return %arg0, %c0_i32, %c0_i32_0 : i32, i32, i32
  }
  func.func @transform_4(%arg0: i32) -> (i32, i32) {
    %c0_i32 = arith.constant 0 : i32
    %c0_i32_0 = arith.constant 0 : i32
    %c0_i32_1 = arith.constant 0 : i32
    return %c0_i32, %c0_i32_0 : i32, i32
  }
  func.func @transform_5(%arg0: i32) -> (i32, i32) {
    %c0_i32 = arith.constant 0 : i32
    %c0_i32_0 = arith.constant 0 : i32
    %c0_i32_1 = arith.constant 0 : i32
    return %c0_i32, %c0_i32_0 : i32, i32
  }
  func.func @transform_6(%arg0: i32) -> (i32, i32, i32) {
    %c0_i32 = arith.constant 0 : i32
    %c0_i32_0 = arith.constant 0 : i32
    %c0_i32_1 = arith.constant 0 : i32
    return %arg0, %c0_i32, %c0_i32_0 : i32, i32, i32
  }
}

</mosaic_0001>

<bundles_post_ra>
// kernel: sage_conv_forward.1
= control target key start
LH: loop header
LB: loop body
LE: loop exit
PB: predicated region body
PF: predicated region fallthrough
CT: control target
= control target key end

     0   :  { %vm129_vm0 = vcmask 130048   ;;  %v1456_v11 = vmov 0   ;;  %vm688_vm1 = vcmask 1043456   ;;  %vm663_vm2 = vcmask 64512   ;;  %s1837_s4 = inlined_call_operand.vmem [shape: bf16[64,128], index: 4, kind: input, shape index: {}]   ;;  %s1838_s1 = inlined_call_operand.vmem [shape: bf16[1,128,16], index: 1, kind: input, shape index: {}]   ;;  %s1839_s0 = inlined_call_operand.vmem [shape: bf16[1,128,128], index: 0, kind: input, shape index: {}]   ;;  %s1840_s3 = inlined_call_operand.vmem [shape: f32[1,128,1], index: 3, kind: input, shape index: {}]   ;;  %s1841_s5 = inlined_call_operand.vmem [shape: f32[8,128], index: 5, kind: input, shape index: {}]   ;;  %s1842_s2 = inlined_call_operand.vmem [shape: bf16[1,8,128], index: 2, kind: input, shape index: {}]   ;;  %s1843_s6 = inlined_call_operand.vmem [shape: f32[1,8,128], index: 6, kind: output, shape index: {}]  }
   0x1   :  { %v1434_v0 = vld [vmem:[%s1837_s4] sm:$0xff]   ;;  %v1436_v2 = vld [vmem:[%s1838_s1 + $0x8] sm:$0xff]   ;;  %v1437_v3 = vld [vmem:[%s1838_s1 + $0x10] sm:$0xff]   ;;  %1432 = vset.pattern.permute.xlu0 %v1456_v11  ;;  %1433 = vset.pattern.permute.xlu1 %v1456_v11  ;;  %vm1458_vm3 = vmmov 0  }
   0x2   :  { %v1435_v1 = vld [vmem:[%s1838_s1] sm:$0xff]   ;;  %1271 = vmatprep.subr.bf16.mxu0 %v1434_v0  ;;  %v1438_v4 = vld [vmem:[%s1838_s1 + $0x18] sm:$0xff]   ;;  %v1440_v6 = vld [vmem:[%s1838_s1 + $0x28] sm:$0xff]  }
   0x3   :  { %1272 = vmatpush3.bf16.msra.mxu0 %v1434_v0  ;;  %1273 = vmatprep.mubr.msk.bf16.mxu0 %vm129_vm0, %v1435_v1  ;;  %v1439_v5 = vld [vmem:[%s1838_s1 + $0x20] sm:$0xff]   ;;  %v1441_v7 = vld [vmem:[%s1838_s1 + $0x30] sm:$0xff]   ;;  %v1442_v8 = vld [vmem:[%s1838_s1 + $0x38] sm:$0xff]  }
   0x4   :  { %1291 = vmatprep.mubr.msk.bf16.mxu1 %vm129_vm0, %v1435_v1  ;;  %v1443_v9 = vld [vmem:[%s1837_s4 + $0x8] sm:$0xff]   ;;  %v1536_v10 = vld [vmem:[%s1839_s0] sm:$0xff]   ;;  %v59_v13 = vld [vmem:[%s1840_s3 + $0x10] sm:$0xff] }
   0x5   :  { %1289 = vmatprep.subr.bf16.mxu1 %v1443_v9  ;;  %v57_v12 = vld [vmem:[%s1840_s3] sm:$0xff]  ;;  %519 = vperm.xlu1 %1433, %v59_v13   ;;  %v58_v14 = vld [vmem:[%s1840_s3 + $0x8] sm:$0xff]  ;;  %v60_v15 = vld [vmem:[%s1840_s3 + $0x18] sm:$0xff] }
   0x6   :  { %1274 = vmatmul.mubr.msk.bf16.vlgmr.msra.gmra.mxu0 %vm129_vm0, %v1436_v2  ;;  %1290 = vmatpush3.bf16.msra.mxu1 %v1443_v9  ;;  %v77_v16 = vld [vmem:[%s1837_s4 + $0x10] sm:$0xf]  ;;  %v61_v17 = vld [vmem:[%s1840_s3 + $0x20] sm:$0xff]  ;;  %v62_v18 = vld [vmem:[%s1840_s3 + $0x28] sm:$0xff] }
   0x7   :  { %1277 = vmatprep.mubr.msk.bf16.mxu0 %vm129_vm0, %v1437_v3  ;;  %509 = vperm.xlu0 %1432, %v57_v12   ;;  %v690_v19 = vsel %vm688_vm1, %v77_v16, 0  ;;  %v63_v20 = vld [vmem:[%s1840_s3 + $0x30] sm:$0xff]  ;;  %v64_v21 = vld [vmem:[%s1840_s3 + $0x38] sm:$0xff]  ;;  %v65_v22 = vld [vmem:[%s1840_s3 + $0x40] sm:$0xff] }
   0x8   :  { %1427 = vmatprep.subr.msk.bf16.mxu1 %vm688_vm1, %v77_v16  ;;  %v66_v23 = vld [vmem:[%s1840_s3 + $0x48] sm:$0xff]  ;;  %v67_v24 = vld [vmem:[%s1840_s3 + $0x50] sm:$0xff]  ;;  %v68_v25 = vld [vmem:[%s1840_s3 + $0x58] sm:$0xff] }
   0x9   :  { %1292 = vmatmul.mubr.msk.bf16.vlgmr.msra.gmra.mxu1 %vm129_vm0, %v1436_v2  ;;  %524 = vperm.xlu1 %1433, %v60_v15   ;;  %v69_v26 = vld [vmem:[%s1840_s3 + $0x60] sm:$0xff]  ;;  %v70_v27 = vld [vmem:[%s1840_s3 + $0x68] sm:$0xff]  ;;  %v71_v28 = vld [vmem:[%s1840_s3 + $0x70] sm:$0xff] }
   0xa   :  { %1295 = vmatprep.mubr.msk.bf16.mxu1 %vm129_vm0, %v1437_v3  ;;  %1340 = vmatpush3.bf16.msra.mxu1 %v690_v19  ;;  %v72_v29 = vld [vmem:[%s1840_s3 + $0x78] sm:$0xff]  ;;  %v1602_v54 = vld [vmem:[%s1839_s0 + $0x8] sm:$0xff]   ;;  %v1607_v55 = vld [vmem:[%s1839_s0 + $0x10] sm:$0xff]  }
   0xb   :  { %514 = vperm.xlu0 %1432, %v58_v14   ;;  %v1614_v56 = vld [vmem:[%s1839_s0 + $0x18] sm:$0xff]   ;;  %v1619_v57 = vld [vmem:[%s1839_s0 + $0x20] sm:$0xff]   ;;  %v1626_v58 = vld [vmem:[%s1839_s0 + $0x28] sm:$0xff]  }
   0xc   :  { %v1631_v59 = vld [vmem:[%s1839_s0 + $0x30] sm:$0xff]   ;;  %v1638_v60 = vld [vmem:[%s1839_s0 + $0x38] sm:$0xff]   ;;  %v1666_v19 = vld [vmem:[%s1841_s5] ss:$0 sm:$0xff] }
   0xd   :  { %534 = vperm.xlu1 %1433, %v62_v18   ;;  %v78_v61 = vld [vmem:[%s1837_s4 + $0x18] sm:$0xf] }
   0xe   :  { %1278 = vmatmul.mubr.msk.bf16.gmra.mxu0 %vm129_vm0, %v1438_v4  ;;  %v790_v62 = vsel %vm688_vm1, %v78_v61, 0 }
   0xf   :  { %1281 = vmatprep.mubr.msk.bf16.mxu0 %vm129_vm0, %v1439_v5  ;;  %529 = vperm.xlu0 %1432, %v61_v17  }
  0x11   :  { %1296 = vmatmul.mubr.msk.bf16.gmra.mxu1 %vm129_vm0, %v1438_v4  ;;  %544 = vperm.xlu1 %1433, %v64_v21  }
  0x12   :  { %1299 = vmatprep.mubr.msk.bf16.mxu1 %vm129_vm0, %v1439_v5 }
  0x13   :  { %539 = vperm.xlu0 %1432, %v63_v20  }
  0x15   :  { %554 = vperm.xlu1 %1433, %v66_v23  }
  0x16   :  { %1282 = vmatmul.mubr.msk.bf16.gmra.mxu0 %vm129_vm0, %v1440_v6 }
  0x17   :  { %1285 = vmatprep.mubr.msk.bf16.mxu0 %vm129_vm0, %v1441_v7  ;;  %549 = vperm.xlu0 %1432, %v65_v22  }
  0x19   :  { %1300 = vmatmul.mubr.msk.bf16.gmra.mxu1 %vm129_vm0, %v1440_v6  ;;  %564 = vperm.xlu1 %1433, %v68_v25  }
  0x1a   :  { %1303 = vmatprep.mubr.msk.bf16.mxu1 %vm129_vm0, %v1441_v7 }
  0x1b   :  { %559 = vperm.xlu0 %1432, %v67_v24  }
  0x1d   :  { %574 = vperm.xlu1 %1433, %v70_v27  }
  0x1e   :  { %1286 = vmatmul.mubr.msk.bf16.gmra.mxu0 %vm129_vm0, %v1442_v8 }
  0x1f   :  { %1323 = vmatprep.mubr.bf16.mxu0 %v1536_v10  ;;  %569 = vperm.xlu0 %1432, %v69_v26  }
  0x21   :  { %1304 = vmatmul.mubr.msk.bf16.gmra.mxu1 %vm129_vm0, %v1442_v8  ;;  %584 = vperm.xlu1 %1433, %v72_v29  }
  0x23   :  { %579 = vperm.xlu0 %1432, %v71_v28  }
  0x80   :  { %v1648_v3 = vpop.permute.xlu1 %519 }
  0x82   :  { %v1646_v2 = vpop.permute.xlu0 %509 }
  0x84   :  { %v1652_v7 = vpop.permute.xlu1 %524 }
  0x86   :  { %v1650_v5 = vpop.permute.xlu0 %514 }
  0x88   :  { %v1656_v11 = vpop.permute.xlu1 %534 }
  0x8a   :  { %v1654_v9 = vpop.permute.xlu0 %529 }
  0x8c   :  { %v1661_v18 = vpop.permute.xlu1 %544 }
  0x8e   :  { %v1658_v14 = vpop.permute.xlu0 %539 }
  0x92   :  { %v1674_v27 = vpop.permute.xlu0 %549 }
  0xc6   :  { %v1275_v30 = vpop.f32.mrf.mxu0 }
  0xc8   :  { %v188_v31 = vpop.f32.mrf.mxu0 }
  0xc9   :  { %v1293_v63 = vpop.f32.mrf.mxu1 }
  0xca   :  { %v1276_v32 = vpop.f32.mrf.mxu0 }
  0xcb   :  { %v355_v52 = vpack.c.bf16 %v1276_v32, %v1275_v30  ;;  %v291_v0 = vpop.f32.mrf.mxu1 }
  0xcc   :  { %v191_v33 = vpop.f32.mrf.mxu0 }
  0xcd   :  { %v354_v53 = vpack.c.bf16 %v191_v33, %v188_v31  ;;  %v1294_v1 = vpop.f32.mrf.mxu1  ;;  %v1678_v31 = vpop.permute.xlu1 %554 }
  0xce   :  { %v1279_v34 = vpop.f32.mrf.mxu0 }
  0xcf   :  { %v294_v4 = vpop.f32.mrf.mxu1 }
  0xd0   :  { %v204_v35 = vpop.f32.mrf.mxu0 }
  0xd1   :  { %v1297_v6 = vpop.f32.mrf.mxu1 }
  0xd2   :  { %v1280_v36 = vpop.f32.mrf.mxu0 }
  0xd3   :  { %v357_v50 = vpack.c.bf16 %v1280_v36, %v1279_v34  ;;  %v307_v8 = vpop.f32.mrf.mxu1 }
  0xd4   :  { %v207_v37 = vpop.f32.mrf.mxu0 }
  0xd5   :  { %v356_v51 = vpack.c.bf16 %v207_v37, %v204_v35  ;;  %v1298_v12 = vpop.f32.mrf.mxu1 }
  0xd6   :  { %v1283_v38 = vpop.f32.mrf.mxu0 }
  0xd7   :  { %v310_v17 = vpop.f32.mrf.mxu1 }
  0xd8   :  { %v220_v39 = vpop.f32.mrf.mxu0 }
  0xd9   :  { %v1672_v26 = vpop.f32.mrf.mxu1 }
  0xda   :  { %v1284_v40 = vpop.f32.mrf.mxu0 }
  0xdb   :  { %v359_v48 = vpack.c.bf16 %v1284_v40, %v1283_v38  ;;  %v323_v38 = vpop.f32.mrf.mxu1 }
  0xdc   :  { %v223_v41 = vpop.f32.mrf.mxu0 }
  0xdd   :  { %v358_v49 = vpack.c.bf16 %v223_v41, %v220_v39 }
  0xde   :  { %v1287_v42 = vpop.f32.mrf.mxu0 }
  0xe0   :  { %v236_v43 = vpop.f32.mrf.mxu0 }
  0xe2   :  { %v1288_v44 = vpop.f32.mrf.mxu0 }
  0xe3   :  { %v361_v45 = vpack.c.bf16 %v1288_v44, %v1287_v42 }
  0xe4   :  { %v239_v46 = vpop.f32.mrf.mxu0 }
  0xe5   :  { %v360_v47 = vpack.c.bf16 %v239_v46, %v236_v43  ;;  %1307 = vmatprep.subr.bf16.mxu0 %v361_v45  ;;  %v1683_v43 = vpop.permute.xlu0 %559 }
  0xe6   :  { %1308 = vmatpush3.bf16.msra.mxu0 %v361_v45 }
  0xe7   :  { %1309 = vmatprep.subr.bf16.mxu0 %v360_v47 }
  0xea   :  { %1310 = vmatpush3.bf16.msra.mxu0 %v360_v47 }
  0xeb   :  { %1311 = vmatprep.subr.bf16.mxu0 %v359_v48 }
  0xee   :  { %1312 = vmatpush3.bf16.msra.mxu0 %v359_v48 }
  0xef   :  { %1313 = vmatprep.subr.bf16.mxu0 %v358_v49 }
  0xf2   :  { %1314 = vmatpush3.bf16.msra.mxu0 %v358_v49 }
  0xf3   :  { %1315 = vmatprep.subr.bf16.mxu0 %v357_v50 }
  0xf6   :  { %1316 = vmatpush3.bf16.msra.mxu0 %v357_v50 }
  0xf7   :  { %1317 = vmatprep.subr.bf16.mxu0 %v356_v51 }
  0xfa   :  { %1318 = vmatpush3.bf16.msra.mxu0 %v356_v51  ;;  %v1302_v51 = vpop.f32.mrf.mxu1 }
  0xfb   :  { %1319 = vmatprep.subr.bf16.mxu0 %v355_v52 }
  0xfe   :  { %1320 = vmatpush3.bf16.msra.mxu0 %v355_v52  ;;  %v1688_v52 = vpop.permute.xlu1 %564 }
  0xff   :  { %1321 = vmatprep.subr.bf16.mxu0 %v354_v53 }
 0x102   :  { %1322 = vmatpush3.bf16.msra.mxu0 %v354_v53 }
 0x103   :  { %1428 = vmatprep.subr.msk.bf16.mxu0 %vm688_vm1, %v78_v61 }
 0x105   :  { %1324 = vmatmul.mubr.bf16.vlgmr.msra.gmra.mxu0 %v1602_v54 }
 0x106   :  { %1327 = vmatprep.mubr.bf16.mxu0 %v1607_v55  ;;  %1358 = vmatpush3.bf16.msra.mxu0 %v790_v62 }
 0x10d   :  { %1328 = vmatmul.mubr.bf16.gmra.mxu0 %v1614_v56 }
 0x10e   :  { %1331 = vmatprep.mubr.bf16.mxu0 %v1619_v57 }
 0x115   :  { %1332 = vmatmul.mubr.bf16.gmra.mxu0 %v1626_v58 }
 0x116   :  { %1335 = vmatprep.mubr.bf16.mxu0 %v1631_v59 }
 0x11d   :  { %1336 = vmatmul.mubr.bf16.gmra.mxu0 %v1638_v60 }
 0x1c5   :  { %v1325_v13 = vpop.f32.mrf.mxu0 }
 0x1c6   :  { %v589_v15 = vmul.f32 %v1325_v13, %v1648_v3 }
 0x1c7   :  { %v444_v16 = vpop.f32.mrf.mxu0 }
 0x1c8   :  { %v587_v20 = vmul.f32 %v1646_v2, %v444_v16  ;;  %v609_v24 = vadd.f32 %v1666_v19, %v589_v15 }
 0x1c9   :  { %v1326_v21 = vpop.f32.mrf.mxu0 }
 0x1ca   :  { %v607_v22 = vadd.f32 %v1666_v19, %v587_v20  ;;  %v590_v23 = vmul.f32 %v1326_v21, %v1652_v7  ;;  %v625_v35 = vadd.f32 %v1293_v63, %v609_v24  ;;  %v326_v20 = vpop.f32.mrf.mxu1  ;;  %v1697_v21 = vpop.permute.xlu0 %569 }
 0x1cb   :  { %v447_v25 = vpop.f32.mrf.mxu0 }
 0x1cc   :  { %v610_v28 = vadd.f32 %v1666_v19, %v590_v23  ;;  %v588_v29 = vmul.f32 %v1650_v5, %v447_v25  ;;  %v623_v32 = vadd.f32 %v607_v22, %v291_v0  ;;  %v641_v47 = vmax.f32 %v625_v35, 0.0 }
 0x1cd   :  { %v1329_v30 = vpop.f32.mrf.mxu0 }
 0x1ce   :  { %v626_v33 = vadd.f32 %v1294_v1, %v610_v28  ;;  %v608_v34 = vadd.f32 %v1666_v19, %v588_v29  ;;  %v593_v36 = vmul.f32 %v1329_v30, %v1658_v14  ;;  %v639_v44 = vmax.f32 %v623_v32, 0.0  ;;  %v1701_v28 = vpop.permute.xlu1 %574 }
 0x1cf   :  { %v460_v37 = vpop.f32.mrf.mxu0 }
 0x1d0   :  { %v624_v39 = vadd.f32 %v608_v34, %v294_v4  ;;  %v591_v40 = vmul.f32 %v1654_v9, %v460_v37  ;;  %v642_v41 = vmax.f32 %v626_v33, 0.0  ;;  %v613_v48 = vadd.f32 %v1666_v19, %v593_v36  ;;  %v1305_v33 = vpop.f32.mrf.mxu1 }
 0x1d1   :  { %v1330_v42 = vpop.f32.mrf.mxu0 }
 0x1d2   :  { %v640_v45 = vmax.f32 %v624_v39, 0.0  ;;  %v611_v46 = vadd.f32 %v1666_v19, %v591_v40  ;;  %v594_v49 = vmul.f32 %v1330_v42, %v1661_v18  ;;  %v656_v62 = vpack.c.bf16 %v642_v41, %v641_v47  ;;  %v1708_v41 = vpop.permute.xlu0 %579 }
 0x1d3   :  { %v463_v50 = vpop.f32.mrf.mxu0  ;;  %v629_v13 = vadd.f32 %v1297_v6, %v613_v48 }
 0x1d4   :  { %v655_v53 = vpack.c.bf16 %v640_v45, %v639_v44  ;;  %v592_v61 = vmul.f32 %v1656_v11, %v463_v50  ;;  %v614_v63 = vadd.f32 %v1666_v19, %v594_v49  ;;  %v627_v1 = vadd.f32 %v611_v46, %v307_v8  ;;  %v339_v46 = vpop.f32.mrf.mxu1 }
 0x1d5   :  { %v1333_v0 = vpop.f32.mrf.mxu0  ;;  %v645_v30 = vmax.f32 %v629_v13, 0.0 }
 0x1d6   :  { %v612_v4 = vadd.f32 %v1666_v19, %v592_v61  ;;  %1341 = vmatprep.mubr.msk.bf16.mxu1 %vm663_vm2, %v655_v53  ;;  %1359 = vmatprep.mubr.msk.bf16.mxu0 %vm663_vm2, %v655_v53  ;;  %v630_v15 = vadd.f32 %v1298_v12, %v614_v63  ;;  %v597_v23 = vmul.f32 %v1333_v0, %v1683_v43  ;;  %v643_v29 = vmax.f32 %v627_v1, 0.0 }
 0x1d7   :  { %v476_v16 = vpop.f32.mrf.mxu0  ;;  %1342 = vmatmul.mubr.msk.bf16.vlgmr.msra.gmra.mxu1 %vm663_vm2, %v656_v62  ;;  %1360 = vmatmul.mubr.msk.bf16.vlgmr.msra.gmra.mxu0 %vm663_vm2, %v656_v62 }
 0x1d8   :  { %v628_v22 = vadd.f32 %v612_v4, %v310_v17  ;;  %v595_v8 = vmul.f32 %v1674_v27, %v476_v16  ;;  %v646_v24 = vmax.f32 %v630_v15, 0.0  ;;  %v617_v17 = vadd.f32 %v1666_v19, %v597_v23  ;;  %v1306_v4 = vpop.f32.mrf.mxu1 }
 0x1d9   :  { %v1334_v25 = vpop.f32.mrf.mxu0 }
 0x1da   :  { %v644_v6 = vmax.f32 %v628_v22, 0.0  ;;  %v598_v12 = vmul.f32 %v1334_v25, %v1688_v52  ;;  %v615_v32 = vadd.f32 %v1666_v19, %v595_v8  ;;  %v658_v37 = vpack.c.bf16 %v646_v24, %v645_v30 }
 0x1db   :  { %v479_v34 = vpop.f32.mrf.mxu0  ;;  %v633_v48 = vadd.f32 %v1672_v26, %v617_v17 }
 0x1dc   :  { %v657_v35 = vpack.c.bf16 %v644_v6, %v643_v29  ;;  %v618_v36 = vadd.f32 %v1666_v19, %v598_v12  ;;  %v596_v39 = vmul.f32 %v1678_v31, %v479_v34  ;;  %v631_v44 = vadd.f32 %v615_v32, %v323_v38  ;;  %v342_v29 = vpop.f32.mrf.mxu1 }
 0x1dd   :  { %v1337_v40 = vpop.f32.mrf.mxu0  ;;  %v649_v15 = vmax.f32 %v633_v48, 0.0 }
 0x1de   :  { %v634_v42 = vadd.f32 %v1302_v51, %v618_v36  ;;  %1345 = vmatprep.mubr.msk.bf16.mxu1 %vm663_vm2, %v657_v35  ;;  %1363 = vmatprep.mubr.msk.bf16.mxu0 %vm663_vm2, %v657_v35  ;;  %v616_v45 = vadd.f32 %v1666_v19, %v596_v39  ;;  %v601_v49 = vmul.f32 %v1337_v40, %v1708_v41  ;;  %v1718_v51 = vpop.permute.xlu1 %584  ;;  %v647_v0 = vmax.f32 %v631_v44, 0.0 }
 0x1df   :  { %v492_v47 = vpop.f32.mrf.mxu0  ;;  %1346 = vmatmul.mubr.msk.bf16.gmra.mxu1 %vm663_vm2, %v658_v37  ;;  %1364 = vmatmul.mubr.msk.bf16.gmra.mxu0 %vm663_vm2, %v658_v37 }
 0x1e0   :  { %v599_v50 = vmul.f32 %v1697_v21, %v492_v47  ;;  %v632_v53 = vadd.f32 %v616_v45, %v326_v20  ;;  %v650_v62 = vmax.f32 %v634_v42, 0.0  ;;  %v621_v26 = vadd.f32 %v1666_v19, %v601_v49 }
 0x1e1   :  { %v1338_v61 = vpop.f32.mrf.mxu0 }
 0x1e2   :  { %v619_v38 = vadd.f32 %v1666_v19, %v599_v50  ;;  %v602_v63 = vmul.f32 %v1338_v61, %v1718_v51  ;;  %v648_v1 = vmax.f32 %v632_v53, 0.0  ;;  %v660_v8 = vpack.c.bf16 %v650_v62, %v649_v15 }
 0x1e3   :  { %v495_v13 = vpop.f32.mrf.mxu0  ;;  %v637_v6 = vadd.f32 %v1305_v33, %v621_v26  ;;  %v1457_v26 = vmov 0.0  }
 0x1e4   :  { %v622_v16 = vadd.f32 %v1666_v19, %v602_v63  ;;  %v600_v22 = vmul.f32 %v1701_v28, %v495_v13  ;;  %v659_v23 = vpack.c.bf16 %v648_v1, %v647_v0  ;;  %v635_v20 = vadd.f32 %v619_v38, %v339_v46  ;;  %1407 = vmatprep.subr.bf16.mxu0 %v1457_v26 }
 0x1e5   :  { %v653_v35 = vmax.f32 %v637_v6, 0.0 }
 0x1e6   :  { %v638_v24 = vadd.f32 %v1306_v4, %v622_v16  ;;  %v620_v25 = vadd.f32 %v1666_v19, %v600_v22  ;;  %1349 = vmatprep.mubr.msk.bf16.mxu1 %vm663_vm2, %v659_v23  ;;  %1367 = vmatprep.mubr.msk.bf16.mxu0 %vm663_vm2, %v659_v23  ;;  %v651_v30 = vmax.f32 %v635_v20, 0.0 }
 0x1e7   :  { %1350 = vmatmul.mubr.msk.bf16.gmra.mxu1 %vm663_vm2, %v660_v8  ;;  %1368 = vmatmul.mubr.msk.bf16.gmra.mxu0 %vm663_vm2, %v660_v8 }
 0x1e8   :  { %v636_v12 = vadd.f32 %v620_v25, %v342_v29  ;;  %v654_v32 = vmax.f32 %v638_v24, 0.0 }
 0x1ea   :  { %v652_v34 = vmax.f32 %v636_v12, 0.0  ;;  %v662_v36 = vpack.c.bf16 %v654_v32, %v653_v35 }
 0x1ec   :  { %v661_v17 = vpack.c.bf16 %v652_v34, %v651_v30 }
 0x1ee   :  { %1353 = vmatprep.mubr.msk.bf16.mxu1 %vm663_vm2, %v661_v17  ;;  %1371 = vmatprep.mubr.msk.bf16.mxu0 %vm663_vm2, %v661_v17 }
 0x1ef   :  { %1354 = vmatmul.mubr.msk.bf16.gmra.mxu1 %vm663_vm2, %v662_v36  ;;  %1372 = vmatmul.mubr.msk.bf16.gmra.mxu0 %vm663_vm2, %v662_v36 }
 0x1f0   :  { %1391 = vmatprep.mubr.bf16.mxu1 %v1536_v10  ;;  %1423 = vmatprep.mubr.msk.bf16.mxu0 %vm1458_vm3, %v1457_v26 }
 0x297   :  { %v1343_v19 = vpop.f32.mrf.mxu1  ;;  %v1744_v16 = vpop.f32.mrf.mxu0 }
 0x299   :  { %v726_v33 = vpop.f32.mrf.mxu1 }
 0x29b   :  { %v1344_v37 = vpop.f32.mrf.mxu1 }
 0x29c   :  { %v890_v13 = vpack.c.bf16 %v1344_v37, %v1343_v19 }
 0x29d   :  { %v729_v39 = vpop.f32.mrf.mxu1 }
 0x29e   :  { %v889_v15 = vpack.c.bf16 %v729_v39, %v726_v33 }
 0x29f   :  { %v1347_v40 = vpop.f32.mrf.mxu1 }
 0x2a1   :  { %v742_v42 = vpop.f32.mrf.mxu1 }
 0x2a3   :  { %v1348_v44 = vpop.f32.mrf.mxu1 }
 0x2a4   :  { %v892_v1 = vpack.c.bf16 %v1348_v44, %v1347_v40 }
 0x2a5   :  { %v745_v45 = vpop.f32.mrf.mxu1 }
 0x2a6   :  { %v891_v4 = vpack.c.bf16 %v745_v45, %v742_v42  ;;  %v1772_v42 = vld [vmem:[%s1841_s5 + $0x1] ss:$0 sm:$0xff] }
 0x2a7   :  { %v1351_v46 = vpop.f32.mrf.mxu1 }
 0x2a9   :  { %v758_v47 = vpop.f32.mrf.mxu1 }
 0x2ab   :  { %v1352_v48 = vpop.f32.mrf.mxu1 }
 0x2ac   :  { %v894_v10 = vpack.c.bf16 %v1352_v48, %v1351_v46 }
 0x2ad   :  { %v761_v49 = vpop.f32.mrf.mxu1 }
 0x2ae   :  { %v893_v0 = vpack.c.bf16 %v761_v49, %v758_v47 }
 0x2af   :  { %v1355_v50 = vpop.f32.mrf.mxu1 }
 0x2b1   :  { %v774_v53 = vpop.f32.mrf.mxu1 }
 0x2b3   :  { %v1356_v61 = vpop.f32.mrf.mxu1 }
 0x2b4   :  { %v896_v62 = vpack.c.bf16 %v1356_v61, %v1355_v50 }
 0x2b5   :  { %v777_v38 = vpop.f32.mrf.mxu1 }
 0x2b6   :  { %v895_v63 = vpack.c.bf16 %v777_v38, %v774_v53  ;;  %1375 = vmatprep.subr.bf16.mxu1 %v896_v62 }
 0x2b7   :  { %1376 = vmatpush3.bf16.msra.mxu1 %v896_v62 }
 0x2b8   :  { %1377 = vmatprep.subr.bf16.mxu1 %v895_v63 }
 0x2bb   :  { %1378 = vmatpush3.bf16.msra.mxu1 %v895_v63 }
 0x2bc   :  { %1379 = vmatprep.subr.bf16.mxu1 %v894_v10 }
 0x2bf   :  { %1380 = vmatpush3.bf16.msra.mxu1 %v894_v10 }
 0x2c0   :  { %1381 = vmatprep.subr.bf16.mxu1 %v893_v0 }
 0x2c3   :  { %1382 = vmatpush3.bf16.msra.mxu1 %v893_v0 }
 0x2c4   :  { %1383 = vmatprep.subr.bf16.mxu1 %v892_v1 }
 0x2c7   :  { %1384 = vmatpush3.bf16.msra.mxu1 %v892_v1 }
 0x2c8   :  { %1385 = vmatprep.subr.bf16.mxu1 %v891_v4 }
 0x2cb   :  { %1386 = vmatpush3.bf16.msra.mxu1 %v891_v4 }
 0x2cc   :  { %1387 = vmatprep.subr.bf16.mxu1 %v890_v13 }
 0x2cf   :  { %1388 = vmatpush3.bf16.msra.mxu1 %v890_v13 }
 0x2d0   :  { %1389 = vmatprep.subr.bf16.mxu1 %v889_v15 }
 0x2d3   :  { %1390 = vmatpush3.bf16.msra.mxu1 %v889_v15 }
 0x2d6   :  { %1392 = vmatmul.mubr.bf16.vlgmr.msra.gmra.mxu1 %v1602_v54  ;;  %v1746_v54 = vpop.f32.mrf.mxu0 }
 0x2d7   :  { %1395 = vmatprep.mubr.bf16.mxu1 %v1607_v55 }
 0x2d8   :  { %v1748_v55 = vpop.f32.mrf.mxu0 }
 0x2de   :  { %1396 = vmatmul.mubr.bf16.gmra.mxu1 %v1614_v56  ;;  %v1750_v56 = vpop.f32.mrf.mxu0 }
 0x2df   :  { %1399 = vmatprep.mubr.bf16.mxu1 %v1619_v57 }
 0x2e0   :  { %v1752_v57 = vpop.f32.mrf.mxu0 }
 0x2e6   :  { %1400 = vmatmul.mubr.bf16.gmra.mxu1 %v1626_v58  ;;  %v1754_v58 = vpop.f32.mrf.mxu0 }
 0x2e7   :  { %1403 = vmatprep.mubr.bf16.mxu1 %v1631_v59 }
 0x2e8   :  { %v1756_v59 = vpop.f32.mrf.mxu0 }
 0x2ea   :  { %v1760_v22 = vpop.f32.mrf.mxu0 }
 0x2ec   :  { %v1369_v20 = vpop.f32.mrf.mxu0 }
 0x2ee   :  { %1404 = vmatmul.mubr.bf16.gmra.mxu1 %v1638_v60  ;;  %v858_v29 = vpop.f32.mrf.mxu0 }
 0x2f0   :  { %v1370_v30 = vpop.f32.mrf.mxu0 }
 0x2f2   :  { %v861_v35 = vpop.f32.mrf.mxu0 }
 0x2f4   :  { %v1373_v19 = vpop.f32.mrf.mxu0 }
 0x2f6   :  { %v874_v40 = vpop.f32.mrf.mxu0 }
 0x2f8   :  { %v1374_v50 = vpop.f32.mrf.mxu0 }
 0x2fa   :  { %v877_v1 = vpop.f32.mrf.mxu0 }
 0x396   :  { %v1758_v60 = vpop.f32.mrf.mxu1 }
 0x398   :  { %v1762_v23 = vpop.f32.mrf.mxu1 }
 0x39a   :  { %v1764_v8 = vpop.f32.mrf.mxu1 }
 0x39c   :  { %v1766_v24 = vpop.f32.mrf.mxu1 }
 0x39e   :  { %v1397_v25 = vpop.f32.mrf.mxu1 }
 0x3a0   :  { %v947_v6 = vpop.f32.mrf.mxu1 }
 0x3a2   :  { %v1398_v12 = vpop.f32.mrf.mxu1 }
 0x3a4   :  { %v950_v32 = vpop.f32.mrf.mxu1 }
 0x3a6   :  { %v1401_v34 = vpop.f32.mrf.mxu1 }
 0x3a7   :  { %v1004_v53 = vmul.f32 %v1401_v34, %v1683_v43 }
 0x3a8   :  { %v963_v17 = vpop.f32.mrf.mxu1 }
 0x3a9   :  { %v1002_v43 = vmul.f32 %v963_v17, %v1674_v27  ;;  %v999_v27 = vmul.f32 %v950_v32, %v1656_v11 }
 0x3aa   :  { %v1402_v36 = vpop.f32.mrf.mxu1 }
 0x3ab   :  { %v1005_v48 = vmul.f32 %v1402_v36, %v1688_v52  ;;  %v1001_v36 = vmul.f32 %v1398_v12, %v1661_v18 }
 0x3ac   :  { %v966_v33 = vpop.f32.mrf.mxu1 }
 0x3ad   :  { %v1025_v10 = vadd.f32 %v1772_v42, %v1005_v48  ;;  %v1021_v17 = vadd.f32 %v1772_v42, %v1001_v36 }
 0x3ae   :  { %v1405_v37 = vpop.f32.mrf.mxu1 }
 0x3af   :  { %v1008_v39 = vmul.f32 %v1405_v37, %v1708_v41  ;;  %v1037_v11 = vadd.f32 %v1756_v59, %v1021_v17 }
 0x3b0   :  { %v979_v44 = vpop.f32.mrf.mxu1 }
 0x3b1   :  { %v1028_v45 = vadd.f32 %v1772_v42, %v1008_v39  ;;  %v1006_v46 = vmul.f32 %v979_v44, %v1697_v21  ;;  %v1003_v21 = vmul.f32 %v966_v33, %v1678_v31  ;;  %v1000_v31 = vmul.f32 %v1397_v25, %v1658_v14 }
 0x3b2   :  { %v1406_v47 = vpop.f32.mrf.mxu1  ;;  %v1022_v44 = vadd.f32 %v1772_v42, %v1002_v43  ;;  %v1019_v25 = vadd.f32 %v1772_v42, %v999_v27  ;;  %v1053_v59 = vmax.f32 %v1037_v11, 0.0 }
 0x3b3   :  { %v1009_v49 = vmul.f32 %v1406_v47, %v1718_v51  ;;  %v1044_v61 = vadd.f32 %v1373_v19, %v1028_v45  ;;  %v1026_v62 = vadd.f32 %v1772_v42, %v1006_v46  ;;  %v1024_v51 = vadd.f32 %v1772_v42, %v1004_v53 }
 0x3b4   :  { %v982_v41 = vpop.f32.mrf.mxu1  ;;  %v1041_v19 = vadd.f32 %v1370_v30, %v1025_v10  ;;  %v1020_v30 = vadd.f32 %v1772_v42, %v1000_v31  ;;  %v998_v46 = vmul.f32 %v947_v6, %v1654_v9  ;;  %v1038_v14 = vadd.f32 %v1022_v44, %v858_v29 }
 0x3b5   :  { %v1029_v38 = vadd.f32 %v1772_v42, %v1009_v49  ;;  %v1007_v63 = vmul.f32 %v982_v41, %v1701_v28  ;;  %v1060_v4 = vmax.f32 %v1044_v61, 0.0  ;;  %v1042_v13 = vadd.f32 %v1026_v62, %v874_v40 }
 0x3b6   :  { %v1023_v28 = vadd.f32 %v1772_v42, %v1003_v21  ;;  %v1040_v33 = vadd.f32 %v1369_v20, %v1024_v51  ;;  %v1057_v40 = vmax.f32 %v1041_v19, 0.0  ;;  %v997_v20 = vmul.f32 %v1764_v8, %v1652_v7 }
 0x3b7   :  { %v1045_v0 = vadd.f32 %v1374_v50, %v1029_v38  ;;  %v1027_v52 = vadd.f32 %v1772_v42, %v1007_v63  ;;  %v1058_v45 = vmax.f32 %v1042_v13, 0.0  ;;  %v1036_v49 = vadd.f32 %v1752_v57, %v1020_v30 }
 0x3b8   :  { %v1039_v18 = vadd.f32 %v1023_v28, %v861_v35  ;;  %v1056_v47 = vmax.f32 %v1040_v33, 0.0  ;;  %v996_v35 = vmul.f32 %v1758_v60, %v1648_v3  ;;  %v1018_v9 = vadd.f32 %v1772_v42, %v998_v46 }
 0x3b9   :  { %v1061_v15 = vmax.f32 %v1045_v0, 0.0  ;;  %v1043_v34 = vadd.f32 %v1027_v52, %v877_v1  ;;  %v1054_v29 = vmax.f32 %v1038_v14, 0.0  ;;  %v1017_v6 = vadd.f32 %v1772_v42, %v997_v20 }
 0x3ba   :  { %v1067_v32 = vpack.c.bf16 %v1057_v40, %v1056_v47  ;;  %v1055_v48 = vmax.f32 %v1039_v18, 0.0  ;;  %v995_v7 = vmul.f32 %v1766_v24, %v1650_v5  ;;  %v1035_v8 = vadd.f32 %v1019_v25, %v1760_v22 }
 0x3bb   :  { %v1069_v37 = vpack.c.bf16 %v1061_v15, %v1060_v4  ;;  %v1059_v39 = vmax.f32 %v1043_v34, 0.0  ;;  %v1016_v53 = vadd.f32 %v1772_v42, %v996_v35  ;;  %v994_v3 = vmul.f32 %v1762_v23, %v1646_v2 }
 0x3bc   :  { %v1066_v50 = vpack.c.bf16 %v1055_v48, %v1054_v29  ;;  %v1052_v57 = vmax.f32 %v1036_v49, 0.0  ;;  %v1034_v60 = vadd.f32 %v1018_v9, %v1754_v58  ;;  %v1033_v41 = vadd.f32 %v1748_v55, %v1017_v6 }
 0x3bd   :  { %1408 = vmatpush3.bf16.msra.mxu0 %v1069_v37  ;;  %v1068_v12 = vpack.c.bf16 %v1059_v39, %v1058_v45  ;;  %v1015_v61 = vadd.f32 %v1772_v42, %v995_v7  ;;  %v1051_v24 = vmax.f32 %v1035_v8, 0.0  ;;  %v1032_v22 = vadd.f32 %v1744_v16, %v1016_v53 }
 0x3be   :  { %1409 = vmatprep.subr.bf16.mxu0 %v1457_v26  ;;  %v1065_v5 = vpack.c.bf16 %v1053_v59, %v1052_v57  ;;  %v1014_v62 = vadd.f32 %v1772_v42, %v994_v3  ;;  %v1050_v38 = vmax.f32 %v1034_v60, 0.0  ;;  %v1049_v2 = vmax.f32 %v1033_v41, 0.0  ;;  %v56_v42 = vld [vmem:[%s1842_s2] sm:$0xf] }
 0x3bf   :  { %v1031_v58 = vadd.f32 %v1015_v61, %v1750_v56  ;;  %v1048_v63 = vmax.f32 %v1032_v22, 0.0 }
 0x3c0   :  { %v1064_v23 = vpack.c.bf16 %v1051_v24, %v1050_v38  ;;  %v1030_v10 = vadd.f32 %v1014_v62, %v1746_v54  ;;  %v1191_v54 = vld [vmem:[%s1841_s5 + $0x2] ss:$0 sm:$0xff] }
 0x3c1   :  { %1410 = vmatpush3.bf16.msra.mxu0 %v1068_v12  ;;  %v1063_v55 = vpack.c.bf16 %v1049_v2, %v1048_v63  ;;  %v1047_v21 = vmax.f32 %v1031_v58, 0.0 }
 0x3c2   :  { %1411 = vmatprep.subr.bf16.mxu0 %v1457_v26  ;;  %v1046_v0 = vmax.f32 %v1030_v10, 0.0 }
 0x3c4   :  { %v1062_v16 = vpack.c.bf16 %v1047_v21, %v1046_v0 }
 0x3c5   :  { %1412 = vmatpush3.bf16.msra.mxu0 %v1067_v32 }
 0x3c6   :  { %1413 = vmatprep.subr.bf16.mxu0 %v1457_v26 }
 0x3c9   :  { %1414 = vmatpush3.bf16.msra.mxu0 %v1066_v50 }
 0x3ca   :  { %1415 = vmatprep.subr.bf16.mxu0 %v1457_v26 }
 0x3cd   :  { %1416 = vmatpush3.bf16.msra.mxu0 %v1065_v5 }
 0x3ce   :  { %1417 = vmatprep.subr.bf16.mxu0 %v1457_v26 }
 0x3d1   :  { %1418 = vmatpush3.bf16.msra.mxu0 %v1064_v23 }
 0x3d2   :  { %1419 = vmatprep.subr.bf16.mxu0 %v1457_v26 }
 0x3d5   :  { %1420 = vmatpush3.bf16.msra.mxu0 %v1063_v55 }
 0x3d6   :  { %1421 = vmatprep.subr.bf16.mxu0 %v1457_v26  ;;  %v1192_v26 = vld [vmem:[%s1841_s5 + $0x3] ss:$0 sm:$0xff] }
 0x3d9   :  { %1422 = vmatpush3.bf16.msra.mxu0 %v1062_v16 }
 0x3dc   :  { %1424 = vmatmul.mubr.bf16.vlgmr.msra.gmra.mxu0 %v56_v42 }
 0x49c   :  { %v1104_v56 = vpop.f32.mrf.mxu0 }
 0x49d   :  { %v1114_v52 = vmul.f32 %v1191_v54, %v1104_v56 }
 0x49e   :  { %v1425_v1 = vpop.f32.mrf.mxu0 }
 0x49f   :  { %v1115_v51 = vsel %vm663_vm2, %v1114_v52, 0.0 }
 0x4a0   :  { %1116 = vadd.xlane.f32.xlu0 %v1115_v51  ;;  %v1107_v43 = vpop.f32.mrf.mxu0 }
 0x4a2   :  { %v1426_v4 = vpop.f32.mrf.mxu0 }
 0x529   :  { %v1117_v13 = vpop.xlane.xlu0 %1116 }
 0x52a   :  { %v1122_v15 = vadd.f32 %v1192_v26, %v1117_v13 }
 0x52c   :  { %v1193_v34 = vmul.f32 -1.442695, %v1122_v15 }
 0x52e   :  { %1452 = vpow2.f32 %v1193_v34 }
 0x53b   :  { %v1453_v36 = vpop.eup %1452 }
 0x53c   :  { %v1126_v19 = vadd.f32 1.0, %v1453_v36 }
 0x53e   :  { %1454 = vrcp.f32 %v1126_v19 }
 0x54b   :  { %v1455_v28 = vpop.eup %1454 }
 0x54c   :  { %1131 = vperm.xlu1 %1433, %v1455_v28  }
 0x5c7   :  { %v1132_v37 = vpop.permute.xlu1 %1131 }
 0x5c8   :  { %1134 = vst [vmem:[%s1843_s6] sm:$0xff] %v1132_v37 }

</bundles_post_ra>
